<compile_context>
chip_gen: v6e
topology: v6e:2x2x1
jax: 0.10.0
libtpu: 0.0.40
codegen_flags: <defaults>
</compile_context>

<pallas_src>
import math
import functools

import jax
import jax.numpy as jnp
from jax.experimental import pallas as pl
from jax.experimental.pallas import tpu as pltpu


def _round_up(x, m):
    return ((x + m - 1) // m) * m


def _pick_batch_tile(B, tile_b):
    """Sublane-aligned batch tile.

    * never larger than the (8-rounded) batch -> no wasted full-tile work;
    * if the whole batch would fit in one tile but can be split, split it so the
      "parallel" batch axis has >= 2 steps (keeps both v7x TensorCores busy).
    NOTE: on v5e (128-wide MXU, tighter VMEM) tile_b=128 is a better default.
    """
    b8 = _round_up(B, 8)
    tb = min(_round_up(tile_b, 8), b8)
    if b8 >= 16 and pl.cdiv(b8, tb) < 2:
        tb = _round_up(pl.cdiv(b8, 2), 8)
    return tb


def _vmem_limit(resident_bytes, streamed_bytes_per_step, extra=0):
    # single-buffered residents + double-buffered streamed blocks + f32
    # intermediates + compiler scratch headroom; clamp to [32 MiB, 64 MiB]
    # (v7x has 64 MiB VMEM per core: do not request v6e-era 128 MiB budgets).
    need = resident_bytes + 2 * streamed_bytes_per_step + extra + (4 << 20)
    return int(min(max(2 * need, 32 << 20), 64 << 20))


def _const_block_spec(block_shape, index_map, single_buffer):
    """BlockSpec for a grid-invariant operand.

    With single_buffer=True requests 1-deep buffering (the block index never
    changes, so the default 2-deep pipeline would allocate a never-used copy).
    """
    if single_buffer:
        return pl.BlockSpec(block_shape, index_map, pipeline_mode=pl.Buffered(1))
    return pl.BlockSpec(block_shape, index_map)


# ---------------------------------------------------------------------------
# Kernel 1: single EqualLinear layer (matmul + scale + bias [+ fused lrelu]).
# ---------------------------------------------------------------------------
def _equal_linear_kernel(x_ref, w_ref, b_ref, o_ref, *, scale, bias_scale,
                         activation, neg_slope):
    # x_ref: (TB, in_dim)        streamed activations
    # w_ref: (in_dim, out_dim)   K-major resident weight (pre-transposed, bf16)
    # b_ref: (1, out_dim)        resident bias (f32)
    # o_ref: (TB, out_dim)
    x = x_ref[...].astype(w_ref.dtype)                  # feed the MXU in weight dtype
    acc = jnp.dot(x, w_ref[...], preferred_element_type=jnp.float32)
    out = acc * scale + b_ref[...].astype(jnp.float32) * bias_scale
    if activation:
        # sqrt(2) already folded into scale / bias_scale -> single vmax epilogue.
        out = jnp.maximum(out, neg_slope * out)
    o_ref[...] = out.astype(o_ref.dtype)


def equal_linear_forward(x, weight, bias, *, lr_mul=1.0, activation=None,
                         tile_b=256, compute_dtype=jnp.bfloat16):
    """EqualLinear forward.

    x:      (B, in_dim)
    weight: (out_dim, in_dim)   -- PyTorch layout; transposed+cast ONCE here
    bias:   (out_dim,)
    """
    B, in_dim = x.shape
    out_dim = weight.shape[0]
    act = bool(activation)
    post = math.sqrt(2.0) if act else 1.0
    scale = (1.0 / math.sqrt(in_dim)) * lr_mul * post
    bias_scale = lr_mul * post

    cdt = jnp.dtype(compute_dtype) if compute_dtype is not None else weight.dtype
    w_km = weight.astype(cdt).T                      # (in_dim, out_dim), K-major
    b2 = bias.reshape(1, out_dim).astype(jnp.float32)

    tb = _pick_batch_tile(B, tile_b)
    grid = (pl.cdiv(B, tb),)

    kernel = functools.partial(
        _equal_linear_kernel, scale=float(scale), bias_scale=float(bias_scale),
        activation=act, neg_slope=0.2)

    resident = w_km.size * w_km.dtype.itemsize + b2.size * 4
    streamed = tb * in_dim * x.dtype.itemsize + tb * out_dim * x.dtype.itemsize
    vmem_limit = _vmem_limit(resident, streamed, extra=2 * tb * out_dim * 4)

    def _run(single_buffer):
        return pl.pallas_call(
            kernel,
            out_shape=jax.ShapeDtypeStruct((B, out_dim), x.dtype),
            grid=grid,
            in_specs=[
                pl.BlockSpec((tb, in_dim), lambda i: (i, 0)),           # streamed x
                _const_block_spec((in_dim, out_dim), lambda i: (0, 0),  # resident W
                                  single_buffer),
                _const_block_spec((1, out_dim), lambda i: (0, 0),       # resident b
                                  single_buffer),
            ],
            out_specs=pl.BlockSpec((tb, out_dim), lambda i: (i, 0)),
            compiler_params=pltpu.CompilerParams(
                dimension_semantics=("parallel",),
                vmem_limit_bytes=vmem_limit),
        )(x, w_km, b2)

    try:
        return _run(True)
    except Exception:   # pipeline_mode=pl.Buffered(1) unsupported on this jax/backend
        return _run(False)


# ---------------------------------------------------------------------------
# Kernel 2: fused style mapping network = PixelNorm + n_mlp x EqualLinear(fused_lrelu).
# All layer weights live in VMEM for the whole call; activations stay on-chip.
# ---------------------------------------------------------------------------
def _style_mlp_kernel(z_ref, w_ref, b_ref, o_ref, *, n_mlp, scale, bias_scale,
                      neg_slope, eps):
    # z_ref: (TB, D)         streamed latent tile
    # w_ref: (n_mlp, D, D)   K-major per-layer weights (in_dim, out_dim), resident
    # b_ref: (n_mlp, 1, D)   per-layer biases, resident (f32)
    # o_ref: (TB, D)
    h = z_ref[...].astype(jnp.float32)
    # PixelNorm over the feature (lane) axis.
    h = h * jax.lax.rsqrt(jnp.mean(h * h, axis=1, keepdims=True) + eps)

    w_dtype = w_ref.dtype

    def layer(l, h):
        # K-major weight slab for layer l -> contraction (((1,),(0,))),
        # no per-step transpose through the XLU; bf16 operands, f32 accumulate.
        acc = jnp.dot(h.astype(w_dtype), w_ref[l],
                      preferred_element_type=jnp.float32)
        # bias scaling is a (1, D) vmul, fully hidden under the (TB,D)x(D,D) matmul.
        pre = acc * scale + b_ref[l].astype(jnp.float32) * bias_scale
        # fused_leaky_relu: sqrt(2) already folded into scale / bias_scale.
        return jnp.maximum(pre, neg_slope * pre)

    # fori_loop (not a static Python unroll) bounds the live range of the carried
    # f32 activation across layers -> no spill pressure at D=512 / n_mlp=8.
    h = jax.lax.fori_loop(0, n_mlp, layer, h)
    o_ref[...] = h.astype(o_ref.dtype)


def style_mapping_forward(z, weights, biases, *, lr_mul=0.01, tile_b=256,
                          compute_dtype=jnp.bfloat16):
    """Generator.style forward (PixelNorm + n_mlp EqualLinear fused_lrelu layers).

    z:       (B, D)
    weights: (n_mlp, D, D)  -- each layer in PyTorch (out_dim, in_dim) layout
    biases:  (n_mlp, D)
    """
    B, D = z.shape
    n_mlp = weights.shape[0]
    assert weights.shape == (n_mlp, D, D) and biases.shape == (n_mlp, D)
    assert D % 128 == 0, "style_dim should be lane-aligned (multiple of 128)"

    sqrt2 = math.sqrt(2.0)
    scale = (1.0 / math.sqrt(D)) * lr_mul * sqrt2
    bias_scale = lr_mul * sqrt2

    cdt = jnp.dtype(compute_dtype) if compute_dtype is not None else weights.dtype
    # one-time layout+dtype prep: (n_mlp, out, in) f32 -> (n_mlp, in, out) bf16
    w_km = jnp.swapaxes(weights.astype(cdt), 1, 2)
    b3 = biases.reshape(n_mlp, 1, D).astype(jnp.float32)

    tb = _pick_batch_tile(B, tile_b)
    grid = (pl.cdiv(B, tb),)

    kernel = functools.partial(
        _style_mlp_kernel, n_mlp=int(n_mlp), scale=float(scale),
        bias_scale=float(bias_scale), neg_slope=0.2, eps=1e-8)

    resident = w_km.size * w_km.dtype.itemsize + b3.size * 4
    streamed = 2 * tb * D * z.dtype.itemsize                 # one in + one out block
    vmem_limit = _vmem_limit(resident, streamed, extra=2 * tb * D * 4)

    def _run(single_buffer):
        return pl.pallas_call(
            kernel,
            out_shape=jax.ShapeDtypeStruct((B, D), z.dtype),
            grid=grid,
            in_specs=[
                pl.BlockSpec((tb, D), lambda i: (i, 0)),                    # latents
                _const_block_spec((n_mlp, D, D), lambda i: (0, 0, 0),       # weights
                                  single_buffer),
                _const_block_spec((n_mlp, 1, D), lambda i: (0, 0, 0),       # biases
                                  single_buffer),
            ],
            out_specs=pl.BlockSpec((tb, D), lambda i: (i, 0)),
            compiler_params=pltpu.CompilerParams(
                dimension_semantics=("parallel",),
                vmem_limit_bytes=vmem_limit),
        )(z, w_km, b3)

    try:
        return _run(True)
    except Exception:   # pipeline_mode=pl.Buffered(1) unsupported on this jax/backend
        return _run(False)


# ---------------------------------------------------------------------------
# Pure-JAX references (f32, HIGHEST precision) for verification.
# ---------------------------------------------------------------------------
def _ref_equal_linear(x, weight, bias, *, lr_mul=1.0, activation=None):
    scale = (1.0 / math.sqrt(x.shape[1])) * lr_mul
    out = jnp.dot(x, (weight * scale).T, precision=jax.lax.Precision.HIGHEST)
    out = out + bias * lr_mul
    if activation:
        out = jnp.where(out >= 0, out, 0.2 * out) * math.sqrt(2.0)
    return out


def _ref_style_mapping(z, weights, biases, *, lr_mul=0.01):
    h = z * jax.lax.rsqrt(jnp.mean(z * z, axis=1, keepdims=True) + 1e-8)
    for l in range(weights.shape[0]):
        h = _ref_equal_linear(h, weights[l], biases[l], lr_mul=lr_mul,
                              activation="fused_lrelu")
    return h


if __name__ == "__main__":
    key = jax.random.PRNGKey(0)
    k_wm, k_bm, k_z, k_x, k_w1, k_w2 = jax.random.split(key, 6)

    batch, style_dim, n_mlp = 8, 128, 4
    lr_mlp = 0.01
    ok = True

    # --- fused style mapping network (PixelNorm + n_mlp EqualLinear fused_lrelu) ---
    # Init mirrors the module: weight ~ N(0,1)/lr_mul.  Biases given nonzero values
    # here purely to exercise the bias path (module default is bias_init=0).
    w_mlp = jax.random.normal(k_wm, (n_mlp, style_dim, style_dim), jnp.float32) / lr_mlp
    b_mlp = jax.random.normal(k_bm, (n_mlp, style_dim), jnp.float32) * 10.0
    z = jax.random.normal(k_z, (batch, style_dim), jnp.float32)

    w_got = jax.block_until_ready(
        style_mapping_forward(z, w_mlp, b_mlp, lr_mul=lr_mlp))
    w_ref = _ref_style_mapping(z, w_mlp, b_mlp, lr_mul=lr_mlp)
    # bf16 MXU operands (f32 accumulate) vs f32 HIGHEST reference -> loose-ish tol.
    ok = ok and bool(jnp.allclose(w_got, w_ref, rtol=5e-2, atol=5e-2))

    # --- standalone EqualLinear: plain-bias path (like ModulatedConv2d.modulation)
    #     and fused_lrelu path ---
    in_dim = out_dim = 128
    x = jax.random.normal(k_x, (batch, in_dim), jnp.float32)
    for k_w, lr_mul, activation in ((k_w1, 1.0, None), (k_w2, 0.01, "fused_lrelu")):
        weight = jax.random.normal(k_w, (out_dim, in_dim), jnp.float32) / lr_mul
        bias = jnp.full((out_dim,), 1.0, dtype=jnp.float32)   # bias_init=1 (modulation)
        got = jax.block_until_ready(
            equal_linear_forward(x, weight, bias, lr_mul=lr_mul, activation=activation))
        ref = _ref_equal_linear(x, weight, bias, lr_mul=lr_mul, activation=activation)
        ok = ok and bool(jnp.allclose(got, ref, rtol=5e-2, atol=5e-2))

    if ok:
        print("KERNEL_OK")
    else:
        print("MISMATCH")
</pallas_src>

<mosaic_0001>
module attributes {stable_mosaic.version = 11 : i64} {
  func.func @_style_mlp_kernel(%arg0: i32, %arg1: memref<8x128xf32, #tpu.memory_space<vmem>>, %arg2: memref<4x128x128xbf16, #tpu.memory_space<vmem>>, %arg3: memref<4x1x128xf32, #tpu.memory_space<vmem>>, %arg4: memref<8x128xf32, #tpu.memory_space<vmem>>) attributes {dimension_semantics = [#tpu.dimension_semantics<parallel>], iteration_bounds = array<i64: 1>, scalar_prefetch = 0 : i64, scratch_operands = 0 : i64, tpu.core_type = #tpu.core_type<tc>, window_params = [{transform_indices = @transform_0, window_bounds = array<i64: 8, 128>}, {pipeline_mode = #tpu.pipeline_mode<synchronous>, transform_indices = @transform_1, window_bounds = array<i64: 4, 128, 128>}, {pipeline_mode = #tpu.pipeline_mode<synchronous>, transform_indices = @transform_2, window_bounds = array<i64: 4, 1, 128>}, {transform_indices = @transform_3, window_bounds = array<i64: 8, 128>}]} {
    %c0 = arith.constant 0 : index
    %c0_0 = arith.constant 0 : index
    %0 = vector.load %arg1[%c0, %c0_0] : memref<8x128xf32, #tpu.memory_space<vmem>>, vector<8x128xf32>
    %1 = arith.mulf %0, %0 : vector<8x128xf32>
    %cst = arith.constant dense<0.000000e+00> : vector<8xf32>
    %2 = vector.multi_reduction <add>, %1, %cst [1] : vector<8x128xf32> to vector<8xf32>
    %3 = vector.shape_cast %2 : vector<8xf32> to vector<8x1xf32>
    %cst_1 = arith.constant 1.280000e+02 : f32
    %4 = vector.broadcast %cst_1 : f32 to vector<8x1xf32>
    %5 = arith.divf %3, %4 : vector<8x1xf32>
    %cst_2 = arith.constant 9.99999993E-9 : f32
    %6 = vector.broadcast %cst_2 : f32 to vector<8x1xf32>
    %7 = arith.addf %5, %6 : vector<8x1xf32>
    %8 = math.rsqrt %7 : vector<8x1xf32>
    %9 = vector.broadcast %8 : vector<8x1xf32> to vector<8x128xf32>
    %10 = arith.mulf %0, %9 : vector<8x128xf32>
    %c0_i32 = arith.constant 0 : i32
    %c4_i32 = arith.constant 4 : i32
    %11 = arith.addi %c0_i32, %c4_i32 : i32
    %c1_i32 = arith.constant 1 : i32
    %12 = scf.for %arg5 = %c0_i32 to %11 step %c1_i32 iter_args(%arg6 = %10) -> (vector<8x128xf32>)  : i32 {
      %14 = arith.truncf %arg6 : vector<8x128xf32> to vector<8x128xbf16>
      %15 = arith.index_cast %arg5 : i32 to index
      %c0_6 = arith.constant 0 : index
      %c0_7 = arith.constant 0 : index
      %16 = vector.load %arg2[%15, %c0_6, %c0_7] : memref<4x128x128xbf16, #tpu.memory_space<vmem>>, vector<1x128x128xbf16>
      %17 = vector.shape_cast %16 : vector<1x128x128xbf16> to vector<128x128xbf16>
      %cst_8 = arith.constant dense<0.000000e+00> : vector<8x128xf32>
      %18 = tpu.matmul %14, %17, %cst_8 {dimension_numbers = #tpu.dot_dimension_numbers<[1], [0], [0], [1], [0, 0, 1, 1], [], []>} : vector<8x128xbf16>, vector<128x128xbf16>, vector<8x128xf32> -> vector<8x128xf32>
      %cst_9 = arith.constant 1.250000e-03 : f32
      %19 = vector.broadcast %cst_9 : f32 to vector<8x128xf32>
      %20 = arith.mulf %18, %19 : vector<8x128xf32>
      %21 = arith.index_cast %arg5 : i32 to index
      %c0_10 = arith.constant 0 : index
      %c0_11 = arith.constant 0 : index
      %22 = vector.load %arg3[%21, %c0_10, %c0_11] : memref<4x1x128xf32, #tpu.memory_space<vmem>>, vector<1x1x128xf32>
      %23 = vector.shape_cast %22 : vector<1x1x128xf32> to vector<1x128xf32>
      %cst_12 = arith.constant 0.0141421352 : f32
      %24 = vector.broadcast %cst_12 : f32 to vector<1x128xf32>
      %25 = arith.mulf %23, %24 : vector<1x128xf32>
      %26 = vector.broadcast %25 : vector<1x128xf32> to vector<8x128xf32>
      %27 = arith.addf %20, %26 : vector<8x128xf32>
      %cst_13 = arith.constant 2.000000e-01 : f32
      %28 = vector.broadcast %cst_13 : f32 to vector<8x128xf32>
      %29 = arith.mulf %28, %27 : vector<8x128xf32>
      %30 = arith.maximumf %27, %29 : vector<8x128xf32>
      scf.yield %30 : vector<8x128xf32>
    }
    %c4_i32_3 = arith.constant 4 : i32
    %c0_4 = arith.constant 0 : index
    %c0_5 = arith.constant 0 : index
    %13 = vector.load %arg4[%c0_4, %c0_5] : memref<8x128xf32, #tpu.memory_space<vmem>>, vector<8x128xf32>
    tpu.vector_store %arg4[%c0_4, %c0_5], %12 {strides = array<i32>} : memref<8x128xf32, #tpu.memory_space<vmem>>, vector<8x128xf32>,
    return
  }
  func.func @transform_0(%arg0: i32) -> (i32, i32) {
    %c0_i32 = arith.constant 0 : i32
    %c0_i32_0 = arith.constant 0 : i32
    return %arg0, %c0_i32 : i32, i32
  }
  func.func @transform_1(%arg0: i32) -> (i32, i32, i32) {
    %c0_i32 = arith.constant 0 : i32
    %c0_i32_0 = arith.constant 0 : i32
    %c0_i32_1 = arith.constant 0 : i32
    %c0_i32_2 = arith.constant 0 : i32
    return %c0_i32, %c0_i32_0, %c0_i32_1 : i32, i32, i32
  }
  func.func @transform_2(%arg0: i32) -> (i32, i32, i32) {
    %c0_i32 = arith.constant 0 : i32
    %c0_i32_0 = arith.constant 0 : i32
    %c0_i32_1 = arith.constant 0 : i32
    %c0_i32_2 = arith.constant 0 : i32
    return %c0_i32, %c0_i32_0, %c0_i32_1 : i32, i32, i32
  }
  func.func @transform_3(%arg0: i32) -> (i32, i32) {
    %c0_i32 = arith.constant 0 : i32
    %c0_i32_0 = arith.constant 0 : i32
    return %arg0, %c0_i32 : i32, i32
  }
}

module attributes {stable_mosaic.version = 11 : i64} {
  func.func @_style_mlp_kernel(%arg0: i32, %arg1: memref<8x128xf32, #tpu.memory_space<vmem>>, %arg2: memref<4x128x128xbf16, #tpu.memory_space<vmem>>, %arg3: memref<4x1x128xf32, #tpu.memory_space<vmem>>, %arg4: memref<8x128xf32, #tpu.memory_space<vmem>>) attributes {dimension_semantics = [#tpu.dimension_semantics<parallel>], iteration_bounds = array<i64: 1>, scalar_prefetch = 0 : i64, scratch_operands = 0 : i64, tpu.core_type = #tpu.core_type<tc>, window_params = [{transform_indices = @transform_0, window_bounds = array<i64: 8, 128>}, {pipeline_mode = #tpu.pipeline_mode<synchronous>, transform_indices = @transform_1, window_bounds = array<i64: 4, 128, 128>}, {pipeline_mode = #tpu.pipeline_mode<synchronous>, transform_indices = @transform_2, window_bounds = array<i64: 4, 1, 128>}, {transform_indices = @transform_3, window_bounds = array<i64: 8, 128>}]} {
    %c0 = arith.constant 0 : index
    %c0_0 = arith.constant 0 : index
    %0 = vector.load %arg1[%c0, %c0_0] : memref<8x128xf32, #tpu.memory_space<vmem>>, vector<8x128xf32>
    %1 = arith.mulf %0, %0 : vector<8x128xf32>
    %cst = arith.constant dense<0.000000e+00> : vector<8xf32>
    %2 = vector.multi_reduction <add>, %1, %cst [1] : vector<8x128xf32> to vector<8xf32>
    %3 = vector.shape_cast %2 : vector<8xf32> to vector<8x1xf32>
    %cst_1 = arith.constant 1.280000e+02 : f32
    %4 = vector.broadcast %cst_1 : f32 to vector<8x1xf32>
    %5 = arith.divf %3, %4 : vector<8x1xf32>
    %cst_2 = arith.constant 9.99999993E-9 : f32
    %6 = vector.broadcast %cst_2 : f32 to vector<8x1xf32>
    %7 = arith.addf %5, %6 : vector<8x1xf32>
    %8 = math.rsqrt %7 : vector<8x1xf32>
    %9 = vector.broadcast %8 : vector<8x1xf32> to vector<8x128xf32>
    %10 = arith.mulf %0, %9 : vector<8x128xf32>
    %c0_i32 = arith.constant 0 : i32
    %c4_i32 = arith.constant 4 : i32
    %11 = arith.addi %c0_i32, %c4_i32 : i32
    %c1_i32 = arith.constant 1 : i32
    %12 = scf.for %arg5 = %c0_i32 to %11 step %c1_i32 iter_args(%arg6 = %10) -> (vector<8x128xf32>)  : i32 {
      %14 = arith.truncf %arg6 : vector<8x128xf32> to vector<8x128xbf16>
      %15 = arith.index_cast %arg5 : i32 to index
      %c0_6 = arith.constant 0 : index
      %c0_7 = arith.constant 0 : index
      %16 = vector.load %arg2[%15, %c0_6, %c0_7] : memref<4x128x128xbf16, #tpu.memory_space<vmem>>, vector<1x128x128xbf16>
      %17 = vector.shape_cast %16 : vector<1x128x128xbf16> to vector<128x128xbf16>
      %cst_8 = arith.constant dense<0.000000e+00> : vector<8x128xf32>
      %18 = tpu.matmul %14, %17, %cst_8 {dimension_numbers = #tpu.dot_dimension_numbers<[1], [0], [0], [1], [0, 0, 1, 1], [], []>} : vector<8x128xbf16>, vector<128x128xbf16>, vector<8x128xf32> -> vector<8x128xf32>
      %cst_9 = arith.constant 1.250000e-03 : f32
      %19 = vector.broadcast %cst_9 : f32 to vector<8x128xf32>
      %20 = arith.mulf %18, %19 : vector<8x128xf32>
      %21 = arith.index_cast %arg5 : i32 to index
      %c0_10 = arith.constant 0 : index
      %c0_11 = arith.constant 0 : index
      %22 = vector.load %arg3[%21, %c0_10, %c0_11] : memref<4x1x128xf32, #tpu.memory_space<vmem>>, vector<1x1x128xf32>
      %23 = vector.shape_cast %22 : vector<1x1x128xf32> to vector<1x128xf32>
      %cst_12 = arith.constant 0.0141421352 : f32
      %24 = vector.broadcast %cst_12 : f32 to vector<1x128xf32>
      %25 = arith.mulf %23, %24 : vector<1x128xf32>
      %26 = vector.broadcast %25 : vector<1x128xf32> to vector<8x128xf32>
      %27 = arith.addf %20, %26 : vector<8x128xf32>
      %cst_13 = arith.constant 2.000000e-01 : f32
      %28 = vector.broadcast %cst_13 : f32 to vector<8x128xf32>
      %29 = arith.mulf %28, %27 : vector<8x128xf32>
      %30 = arith.maximumf %27, %29 : vector<8x128xf32>
      scf.yield %30 : vector<8x128xf32>
    }
    %c4_i32_3 = arith.constant 4 : i32
    %c0_4 = arith.constant 0 : index
    %c0_5 = arith.constant 0 : index
    %13 = vector.load %arg4[%c0_4, %c0_5] : memref<8x128xf32, #tpu.memory_space<vmem>>, vector<8x128xf32>
    tpu.vector_store %arg4[%c0_4, %c0_5], %12 {strides = array<i32>} : memref<8x128xf32, #tpu.memory_space<vmem>>, vector<8x128xf32>,
    return
  }
  func.func @transform_0(%arg0: i32) -> (i32, i32) {
    %c0_i32 = arith.constant 0 : i32
    %c0_i32_0 = arith.constant 0 : i32
    return %arg0, %c0_i32 : i32, i32
  }
  func.func @transform_1(%arg0: i32) -> (i32, i32, i32) {
    %c0_i32 = arith.constant 0 : i32
    %c0_i32_0 = arith.constant 0 : i32
    %c0_i32_1 = arith.constant 0 : i32
    %c0_i32_2 = arith.constant 0 : i32
    return %c0_i32, %c0_i32_0, %c0_i32_1 : i32, i32, i32
  }
  func.func @transform_2(%arg0: i32) -> (i32, i32, i32) {
    %c0_i32 = arith.constant 0 : i32
    %c0_i32_0 = arith.constant 0 : i32
    %c0_i32_1 = arith.constant 0 : i32
    %c0_i32_2 = arith.constant 0 : i32
    return %c0_i32, %c0_i32_0, %c0_i32_1 : i32, i32, i32
  }
  func.func @transform_3(%arg0: i32) -> (i32, i32) {
    %c0_i32 = arith.constant 0 : i32
    %c0_i32_0 = arith.constant 0 : i32
    return %arg0, %c0_i32 : i32, i32
  }
}

</mosaic_0001>

<bundles_post_ra>
// kernel: tpu_custom_call.1
= control target key start
LH: loop header
LB: loop body
LE: loop exit
PB: predicated region body
PF: predicated region fallthrough
CT: control target
= control target key end

     0   :  { %8 = vsyncpa [#allocation3], 0  ;;  %s450_s0 = inlined_call_operand.hbm [shape: f32[8,128], index: 0, kind: input, shape index: {}]   ;;  %s451_s1 = inlined_call_operand.hbm [shape: bf16[4,128,128], index: 1, kind: input, shape index: {}]   ;;  %s452_s2 = inlined_call_operand.hbm [shape: f32[4,1,128], index: 2, kind: input, shape index: {}]   ;;  %s453_s3 = inlined_call_operand.hbm [shape: f32[8,128], index: 3, kind: output, shape index: {}]  }
   0x1   :  { %9 = vsyncpa [#allocation6], 0 }
   0x2   :  { %10 = vsyncpa [#allocation4], 0  ;;  %s398_s12 = smov [#allocation5]  }
   0x3   :  { %s26_s13 = sshll.u32 %s398_s12, 4  ;;  %s27_s13 = int_to_ptr.vmem [resolvable:$true] %s26_s13 }
   0x4   :  { %s304_s14 = scalar_lea.vmem %s27_s13, 4096  ;;  %p309_p1 = scmp.lt.s32.totalorder %s27_s13, %s27_s13 }
   0x5   :  { %p305_p0 = scmp.ne.s32.totalorder %s27_s13, %s304_s14  ;;  %p310_p2 = scmp.lt.s32.totalorder %s304_s14, %s304_s14 }
   0x7   :  { %p311_p3 = por %p310_p2, %p309_p1 }
   0x9   :  { %p312_p4 = pnand %p311_p3, %p305_p0 }
   0xb   :  { %315 = shalt.err (!%p312_p4)
}
   0xc   :  { %s399_s15 = smov 64   ;;  %s400_s16 = smov 4  }
   0xd   :  { %32 = dma.hbm_to_vmem [thread:$0]  %s451_s1, 4096, %s27_s13, [#allocation6], %s399_s15, %s399_s15, %s400_s16  }
   0xe   :  { %s401_s19 = smov [#allocation2]   ;;  %s402_s21 = smov [#allocation7]  }
   0xf   :  { %s17_s20 = sshll.u32 %s401_s19, 4  ;;  %s38_s22 = sshll.u32 %s402_s21, 4  ;;  %s18_s20 = int_to_ptr.vmem [resolvable:$true] %s17_s20  ;;  %s39_s22 = int_to_ptr.vmem [resolvable:$true] %s38_s22 }
  0x10   :  { %s324_s23 = scalar_lea.vmem %s18_s20, 128  ;;  %p329_p6 = scmp.lt.s32.totalorder %s18_s20, %s18_s20 }
  0x11   :  { %p325_p5 = scmp.ne.s32.totalorder %s18_s20, %s324_s23  ;;  %p330_p7 = scmp.lt.s32.totalorder %s324_s23, %s324_s23 }
  0x13   :  { %p331_p8 = por %p330_p7, %p329_p6 }
  0x15   :  { %p332_p9 = pnand %p331_p8, %p325_p5 }
  0x17   :  { %335 = shalt.err (!%p332_p9)
}
  0x18   :  { %20 = dma.hbm_to_vmem [thread:$0]  %s450_s0, 128, %s18_s20, [#allocation3]  }
  0x19   :  { %s344_s26 = scalar_lea.vmem %s39_s22, 64  ;;  %p349_p11 = scmp.lt.s32.totalorder %s39_s22, %s39_s22 }
  0x1a   :  { %p345_p10 = scmp.ne.s32.totalorder %s39_s22, %s344_s26  ;;  %p350_p12 = scmp.lt.s32.totalorder %s344_s26, %s344_s26 }
  0x1c   :  { %p351_p13 = por %p350_p12, %p349_p11 }
  0x1e   :  { %p352_p0 = pnand %p351_p13, %p345_p10 }
  0x20   :  { %355 = shalt.err (!%p352_p0)
}
  0x21   :  { %s403_s1 = smov 16   ;;  %s404_s27 = smov 1  }
  0x22   :  { %44 = dma.hbm_to_vmem [thread:$0]  %s452_s2, 64, %s39_s22, [#allocation6], %s403_s1, %s403_s1, %s404_s27  }
  0x23   :  { %384 = dma.done.wait [#allocation3], 128  }
  0x24   :  { %385 = vsyncadd [#allocation3], 4294967168 }
  0x25   :  { %386 = dma.done.wait [#allocation6], 4160  }
  0x26   :  { %387 = vsyncadd [#allocation6], 4294963136  ;;  %v55_v0 = vld [vmem:[#allocation2] sm:$0xff]  ;;  %s437_s0 = smov 0  }
  0x27   :  { %v56_v1 = vmul.f32 %v55_v0, %v55_v0 }
  0x29   :  { %57 = vadd.xlane.f32.xlu0 %v56_v1 }
  0xb2   :  { %v58_v2 = vpop.xlane.xlu0 %57 }
  0xb3   :  { %v60_v3 = vmul.f32 0.0078125, %v58_v2 }
  0xb5   :  { %v61_v4 = vadd.f32 1e-08, %v60_v3 }
  0xb7   :  { %286 = vrsqrt.f32 %v61_v4 }
  0xc4   :  { %v287_v5 = vpop.eup %286 }
  0xc5   :  { %v63_v6 = vmul.f32 %v287_v5, %v55_v0  }
  0xc7   :  { %v390_v7 = vmov %v63_v6  }
  0xc8 LB: > { %v405_v8 = vmov 0.0   ;;  %vm406_vm0 = vmmov 0   ;;  %s230_s2 = sshll.u32 %s396_s0, 6  ;;  %v71_v17 = vpack.c.bf16 %v392_v7, %v392_v7  ;;  %v184_v18 = vlaneseq  ;;  %s180_s4 = scalar_lea.vmem [#allocation7], %s396_s0  ;;  %s396_s0 = sphi %s437_s0, %s69_s0   ;;  %v392_v7 = vphi %v390_v7, %v391_v7  }
  0xc9   : > { %240 = vmatprep.subr.bf16.mxu0 %v405_v8  ;;  %256 = vmatprep.mubr.msk.bf16.mxu0 %vm406_vm0, %v405_v8  ;;  %s74_s30 = scalar_lea.vmem [#allocation5], %s230_s2  ;;  %v181_v20 = vld [vmem:[%s180_s4] sm:$0x1]  ;;  %s69_s0 = sadd.s32 1, %s396_s0  }
  0xca   : > { %v288_v9 = vld [vmem:[%s74_s30 + $0x38] sm:$0xff]   ;;  %v289_v10 = vld [vmem:[%s74_s30 + $0x30] sm:$0xff]   ;;  %v290_v11 = vld [vmem:[%s74_s30 + $0x28] sm:$0xff]   ;;  %v185_v19 = vshrl.u32 %v184_v18, 7  ;;  %v182_v21 = vmul.f32 0.014142135, %v181_v20 }
  0xcb   : > { %241 = vmatpush3.bf16.msra.mxu0 %v288_v9  ;;  %v291_v12 = vld [vmem:[%s74_s30 + $0x20] sm:$0xff]   ;;  %v292_v13 = vld [vmem:[%s74_s30 + $0x18] sm:$0xff]   ;;  %v293_v14 = vld [vmem:[%s74_s30 + $0x10] sm:$0xff]   ;;  %p66_p1 = scmp.ge.s32.totalorder %s69_s0, 4  }
  0xcc   : > { %242 = vmatprep.subr.bf16.mxu0 %v405_v8  ;;  %v294_v15 = vld [vmem:[%s74_s30 + $0x8] sm:$0xff]   ;;  %v295_v16 = vld [vmem:[%s74_s30] sm:$0xff]   ;;  %v186_v22 = vsub.s32 0, %v185_v19  ;;  %s407_s5 = smov (%p66_p1), [#allocation8]  }
  0xcd   :  { %s199_s6 = sshll.u32 (%p66_p1), %s407_s5, 4  ;;  %s200_s6 = int_to_ptr.vmem [resolvable:$true] %s199_s6 }
  0xce   : > { %v187_v23 = vrot.slane %v182_v21, %v186_v22  ;;  %s356_s7 = scalar_lea.vmem (%p66_p1), %s200_s6, 128  ;;  %p361_p3 = scmp.lt.s32.totalorder (%p66_p1), %s200_s6, %s200_s6 }
  0xcf   : > { %243 = vmatpush3.bf16.msra.mxu0 %v289_v10  ;;  %p357_p2 = scmp.ne.s32.totalorder (%p66_p1), %s200_s6, %s356_s7  ;;  %p362_p4 = scmp.lt.s32.totalorder (%p66_p1), %s356_s7, %s356_s7 }
  0xd0   : > { %244 = vmatprep.subr.bf16.mxu0 %v405_v8 }
  0xd1   :  { %p363_p5 = por (%p66_p1), %p362_p4, %p361_p3 }
  0xd3   : > { %245 = vmatpush3.bf16.msra.mxu0 %v290_v11  ;;  %p364_p6 = pnand (%p66_p1), %p363_p5, %p357_p2 }
  0xd4   : > { %246 = vmatprep.subr.bf16.mxu0 %v405_v8 }
  0xd7   : > { %247 = vmatpush3.bf16.msra.mxu0 %v291_v12 }
  0xd8   : > { %248 = vmatprep.subr.bf16.mxu0 %v405_v8 }
  0xdb   : > { %249 = vmatpush3.bf16.msra.mxu0 %v292_v13 }
  0xdc   : > { %250 = vmatprep.subr.bf16.mxu0 %v405_v8 }
  0xdf   : > { %251 = vmatpush3.bf16.msra.mxu0 %v293_v14 }
  0xe0   : > { %252 = vmatprep.subr.bf16.mxu0 %v405_v8 }
  0xe3   : > { %253 = vmatpush3.bf16.msra.mxu0 %v294_v15 }
  0xe4   : > { %254 = vmatprep.subr.bf16.mxu0 %v405_v8 }
  0xe7   : > { %255 = vmatpush3.bf16.msra.mxu0 %v295_v16 }
  0xea   : > { %257 = vmatmul.mubr.bf16.vlgmr.msra.gmra.mxu0 %v71_v17 }
 0x1aa   : > { %v173_v24 = vpop.f32.mrf.mxu0 }
 0x1ab   : > { %v179_v25 = vmul.f32 0.00125, %v173_v24 }
 0x1ac   : > { %v258_v26 = vpop.f32.mrf.mxu0 }
 0x1ad   : > { %v189_v27 = vadd.f32 %v187_v23, %v179_v25 }
 0x1ae   : > { %v176_v28 = vpop.f32.mrf.mxu0 }
 0x1af   : > { %v190_v29 = vmul.f32 0.2, %v189_v27  ;;  %68 = sbr.rel (!%p66_p1) target bundleno = 200 (0xc8), region = 53 }
 0x1b0   : > { %v259_v30 = vpop.f32.mrf.mxu0 }
 0x1b1   : > { %v191_v31 = vmax.f32 %v189_v27, %v190_v29  }
 0x1b3   : > { %v391_v7 = vmov %v191_v31   ;;  %192 = vst [vmem:[#allocation8] sm:$0xff] (%p66_p1), %v191_v31 }
 0x1b4   :  { %367 = shalt.err (!%p364_p6)
}
 0x1b5   :  { %202 = dma.vmem_to_hbm [thread:$0]  %s200_s6, 128, %s453_s3, [#allocation4]  }
 0x1b6   :  { %388 = dma.done.wait [#allocation4], 128  }
 0x1b7   :  { %389 = vsyncadd [#allocation4], 4294967168 }
 0x1b8   :  { %206 = vsyncpa [#allocation3], 1 }
 0x1b9   :  { %207 = vsyncpa [#allocation6], 1 }
 0x1ba   :  { %208 = vsyncpa [#allocation4], 1 }

// kernel: tpu_custom_call.1
= control target key start
LH: loop header
LB: loop body
LE: loop exit
PB: predicated region body
PF: predicated region fallthrough
CT: control target
= control target key end

     0   :  { %8 = vsyncpa [#allocation3], 0  ;;  %s450_s0 = inlined_call_operand.hbm [shape: f32[8,128], index: 0, kind: input, shape index: {}]   ;;  %s451_s1 = inlined_call_operand.hbm [shape: bf16[4,128,128], index: 1, kind: input, shape index: {}]   ;;  %s452_s2 = inlined_call_operand.hbm [shape: f32[4,1,128], index: 2, kind: input, shape index: {}]   ;;  %s453_s3 = inlined_call_operand.hbm [shape: f32[8,128], index: 3, kind: output, shape index: {}]  }
   0x1   :  { %9 = vsyncpa [#allocation6], 0 }
   0x2   :  { %10 = vsyncpa [#allocation4], 0  ;;  %s398_s12 = smov [#allocation5]  }
   0x3   :  { %s26_s13 = sshll.u32 %s398_s12, 4  ;;  %s27_s13 = int_to_ptr.vmem [resolvable:$true] %s26_s13 }
   0x4   :  { %s304_s14 = scalar_lea.vmem %s27_s13, 4096  ;;  %p309_p1 = scmp.lt.s32.totalorder %s27_s13, %s27_s13 }
   0x5   :  { %p305_p0 = scmp.ne.s32.totalorder %s27_s13, %s304_s14  ;;  %p310_p2 = scmp.lt.s32.totalorder %s304_s14, %s304_s14 }
   0x7   :  { %p311_p3 = por %p310_p2, %p309_p1 }
   0x9   :  { %p312_p4 = pnand %p311_p3, %p305_p0 }
   0xb   :  { %315 = shalt.err (!%p312_p4)
}
   0xc   :  { %s399_s15 = smov 64   ;;  %s400_s16 = smov 4  }
   0xd   :  { %32 = dma.hbm_to_vmem [thread:$0]  %s451_s1, 4096, %s27_s13, [#allocation6], %s399_s15, %s399_s15, %s400_s16  }
   0xe   :  { %s401_s19 = smov [#allocation2]   ;;  %s402_s21 = smov [#allocation7]  }
   0xf   :  { %s17_s20 = sshll.u32 %s401_s19, 4  ;;  %s38_s22 = sshll.u32 %s402_s21, 4  ;;  %s18_s20 = int_to_ptr.vmem [resolvable:$true] %s17_s20  ;;  %s39_s22 = int_to_ptr.vmem [resolvable:$true] %s38_s22 }
  0x10   :  { %s324_s23 = scalar_lea.vmem %s18_s20, 128  ;;  %p329_p6 = scmp.lt.s32.totalorder %s18_s20, %s18_s20 }
  0x11   :  { %p325_p5 = scmp.ne.s32.totalorder %s18_s20, %s324_s23  ;;  %p330_p7 = scmp.lt.s32.totalorder %s324_s23, %s324_s23 }
  0x13   :  { %p331_p8 = por %p330_p7, %p329_p6 }
  0x15   :  { %p332_p9 = pnand %p331_p8, %p325_p5 }
  0x17   :  { %335 = shalt.err (!%p332_p9)
}
  0x18   :  { %20 = dma.hbm_to_vmem [thread:$0]  %s450_s0, 128, %s18_s20, [#allocation3]  }
  0x19   :  { %s344_s26 = scalar_lea.vmem %s39_s22, 64  ;;  %p349_p11 = scmp.lt.s32.totalorder %s39_s22, %s39_s22 }
  0x1a   :  { %p345_p10 = scmp.ne.s32.totalorder %s39_s22, %s344_s26  ;;  %p350_p12 = scmp.lt.s32.totalorder %s344_s26, %s344_s26 }
  0x1c   :  { %p351_p13 = por %p350_p12, %p349_p11 }
  0x1e   :  { %p352_p0 = pnand %p351_p13, %p345_p10 }
  0x20   :  { %355 = shalt.err (!%p352_p0)
}
  0x21   :  { %s403_s1 = smov 16   ;;  %s404_s27 = smov 1  }
  0x22   :  { %44 = dma.hbm_to_vmem [thread:$0]  %s452_s2, 64, %s39_s22, [#allocation6], %s403_s1, %s403_s1, %s404_s27  }
  0x23   :  { %384 = dma.done.wait [#allocation3], 128  }
  0x24   :  { %385 = vsyncadd [#allocation3], 4294967168 }
  0x25   :  { %386 = dma.done.wait [#allocation6], 4160  }
  0x26   :  { %387 = vsyncadd [#allocation6], 4294963136  ;;  %v55_v0 = vld [vmem:[#allocation2] sm:$0xff]  ;;  %s437_s0 = smov 0  }
  0x27   :  { %v56_v1 = vmul.f32 %v55_v0, %v55_v0 }
  0x29   :  { %57 = vadd.xlane.f32.xlu0 %v56_v1 }
  0xb2   :  { %v58_v2 = vpop.xlane.xlu0 %57 }
  0xb3   :  { %v60_v3 = vmul.f32 0.0078125, %v58_v2 }
  0xb5   :  { %v61_v4 = vadd.f32 1e-08, %v60_v3 }
  0xb7   :  { %286 = vrsqrt.f32 %v61_v4 }
  0xc4   :  { %v287_v5 = vpop.eup %286 }
  0xc5   :  { %v63_v6 = vmul.f32 %v287_v5, %v55_v0  }
  0xc7   :  { %v390_v7 = vmov %v63_v6  }
  0xc8 LB: > { %v405_v8 = vmov 0.0   ;;  %vm406_vm0 = vmmov 0   ;;  %s230_s2 = sshll.u32 %s396_s0, 6  ;;  %v71_v17 = vpack.c.bf16 %v392_v7, %v392_v7  ;;  %v184_v18 = vlaneseq  ;;  %s180_s4 = scalar_lea.vmem [#allocation7], %s396_s0  ;;  %s396_s0 = sphi %s437_s0, %s69_s0   ;;  %v392_v7 = vphi %v390_v7, %v391_v7  }
  0xc9   : > { %240 = vmatprep.subr.bf16.mxu0 %v405_v8  ;;  %256 = vmatprep.mubr.msk.bf16.mxu0 %vm406_vm0, %v405_v8  ;;  %s74_s30 = scalar_lea.vmem [#allocation5], %s230_s2  ;;  %v181_v20 = vld [vmem:[%s180_s4] sm:$0x1]  ;;  %s69_s0 = sadd.s32 1, %s396_s0  }
  0xca   : > { %v288_v9 = vld [vmem:[%s74_s30 + $0x38] sm:$0xff]   ;;  %v289_v10 = vld [vmem:[%s74_s30 + $0x30] sm:$0xff]   ;;  %v290_v11 = vld [vmem:[%s74_s30 + $0x28] sm:$0xff]   ;;  %v185_v19 = vshrl.u32 %v184_v18, 7  ;;  %v182_v21 = vmul.f32 0.014142135, %v181_v20 }
  0xcb   : > { %241 = vmatpush3.bf16.msra.mxu0 %v288_v9  ;;  %v291_v12 = vld [vmem:[%s74_s30 + $0x20] sm:$0xff]   ;;  %v292_v13 = vld [vmem:[%s74_s30 + $0x18] sm:$0xff]   ;;  %v293_v14 = vld [vmem:[%s74_s30 + $0x10] sm:$0xff]   ;;  %p66_p1 = scmp.ge.s32.totalorder %s69_s0, 4  }
  0xcc   : > { %242 = vmatprep.subr.bf16.mxu0 %v405_v8  ;;  %v294_v15 = vld [vmem:[%s74_s30 + $0x8] sm:$0xff]   ;;  %v295_v16 = vld [vmem:[%s74_s30] sm:$0xff]   ;;  %v186_v22 = vsub.s32 0, %v185_v19  ;;  %s407_s5 = smov (%p66_p1), [#allocation8]  }
  0xcd   :  { %s199_s6 = sshll.u32 (%p66_p1), %s407_s5, 4  ;;  %s200_s6 = int_to_ptr.vmem [resolvable:$true] %s199_s6 }
  0xce   : > { %v187_v23 = vrot.slane %v182_v21, %v186_v22  ;;  %s356_s7 = scalar_lea.vmem (%p66_p1), %s200_s6, 128  ;;  %p361_p3 = scmp.lt.s32.totalorder (%p66_p1), %s200_s6, %s200_s6 }
  0xcf   : > { %243 = vmatpush3.bf16.msra.mxu0 %v289_v10  ;;  %p357_p2 = scmp.ne.s32.totalorder (%p66_p1), %s200_s6, %s356_s7  ;;  %p362_p4 = scmp.lt.s32.totalorder (%p66_p1), %s356_s7, %s356_s7 }
  0xd0   : > { %244 = vmatprep.subr.bf16.mxu0 %v405_v8 }
  0xd1   :  { %p363_p5 = por (%p66_p1), %p362_p4, %p361_p3 }
  0xd3   : > { %245 = vmatpush3.bf16.msra.mxu0 %v290_v11  ;;  %p364_p6 = pnand (%p66_p1), %p363_p5, %p357_p2 }
  0xd4   : > { %246 = vmatprep.subr.bf16.mxu0 %v405_v8 }
  0xd7   : > { %247 = vmatpush3.bf16.msra.mxu0 %v291_v12 }
  0xd8   : > { %248 = vmatprep.subr.bf16.mxu0 %v405_v8 }
  0xdb   : > { %249 = vmatpush3.bf16.msra.mxu0 %v292_v13 }
  0xdc   : > { %250 = vmatprep.subr.bf16.mxu0 %v405_v8 }
  0xdf   : > { %251 = vmatpush3.bf16.msra.mxu0 %v293_v14 }
  0xe0   : > { %252 = vmatprep.subr.bf16.mxu0 %v405_v8 }
  0xe3   : > { %253 = vmatpush3.bf16.msra.mxu0 %v294_v15 }
  0xe4   : > { %254 = vmatprep.subr.bf16.mxu0 %v405_v8 }
  0xe7   : > { %255 = vmatpush3.bf16.msra.mxu0 %v295_v16 }
  0xea   : > { %257 = vmatmul.mubr.bf16.vlgmr.msra.gmra.mxu0 %v71_v17 }
 0x1aa   : > { %v173_v24 = vpop.f32.mrf.mxu0 }
 0x1ab   : > { %v179_v25 = vmul.f32 0.00125, %v173_v24 }
 0x1ac   : > { %v258_v26 = vpop.f32.mrf.mxu0 }
 0x1ad   : > { %v189_v27 = vadd.f32 %v187_v23, %v179_v25 }
 0x1ae   : > { %v176_v28 = vpop.f32.mrf.mxu0 }
 0x1af   : > { %v190_v29 = vmul.f32 0.2, %v189_v27  ;;  %68 = sbr.rel (!%p66_p1) target bundleno = 200 (0xc8), region = 53 }
 0x1b0   : > { %v259_v30 = vpop.f32.mrf.mxu0 }
 0x1b1   : > { %v191_v31 = vmax.f32 %v189_v27, %v190_v29  }
 0x1b3   : > { %v391_v7 = vmov %v191_v31   ;;  %192 = vst [vmem:[#allocation8] sm:$0xff] (%p66_p1), %v191_v31 }
 0x1b4   :  { %367 = shalt.err (!%p364_p6)
}
 0x1b5   :  { %202 = dma.vmem_to_hbm [thread:$0]  %s200_s6, 128, %s453_s3, [#allocation4]  }
 0x1b6   :  { %388 = dma.done.wait [#allocation4], 128  }
 0x1b7   :  { %389 = vsyncadd [#allocation4], 4294967168 }
 0x1b8   :  { %206 = vsyncpa [#allocation3], 1 }
 0x1b9   :  { %207 = vsyncpa [#allocation6], 1 }
 0x1ba   :  { %208 = vsyncpa [#allocation4], 1 }

</bundles_post_ra>
